<compile_context>
chip_gen: v6e
topology: v6e:2x2x1
jax: 0.10.0
libtpu: 0.0.40
codegen_flags: <defaults>
</compile_context>

<pallas_src>
import functools

import jax
import jax.numpy as jnp
from jax.experimental import pallas as pl
from jax.experimental.pallas import tpu as pltpu

LANES = 128
SUBLANES = 8


def _round_up(x, m):
    return (x + m - 1) // m * m


def _round_down(x, m):
    return x // m * m


def _vmem_capacity_bytes():
    try:
        return int(pltpu.get_tpu_info().vmem_capacity_bytes)
    except Exception:
        return 64 << 20  # conservative default (v7x per-TensorCore VMEM)


def _per_tile_budget_bytes(cap):
    # Budget for ONE pipelined input tile; double-buffering plus in-kernel
    # temporaries / outputs / scratch must stay well under `cap`.
    return int(min(cap // 8, 12 << 20))


# --------------------------- elementwise focal BCE ---------------------------

def _focal_elem(x, t, *, alpha, gamma, approx_reciprocal, hard_targets):
    """Elementwise focal BCE-with-logits (matches BCEFocalLoss)."""
    e = jnp.exp(-jnp.abs(x))
    bce = jnp.maximum(x, 0.0) - x * t + jnp.log1p(e)       # exact log1p term
    s = pl.reciprocal(1.0 + e, approx=approx_reciprocal)    # sigmoid(|x|), EUP
    p = jnp.where(x >= 0.0, s, 1.0 - s)                     # sigmoid(x)

    if hard_targets:
        # targets exactly {0,1}: select the base first -> one square/pow only.
        q = jnp.where(t > 0.5, 1.0 - p, p)
        w = q * q if gamma == 2.0 else q ** gamma
        w = jnp.where(t > 0.5, alpha * w, w)
    else:
        if gamma == 2.0:   # static fast path: no pow -> exp(g*log(x)) on EUP
            w_pos = (1.0 - p) * (1.0 - p)
            w_neg = p * p
        else:
            w_pos = (1.0 - p) ** gamma
            w_neg = p ** gamma
        w = alpha * t * w_pos + (1.0 - t) * w_neg
    return bce * w


# -------------------- fused framewise-max + 2-way focal ----------------------

def _fused_2way_kernel(fw_ref, logit_ref, tgt_ref, main_ref, aux_ref, run_ref, *,
                       alpha, gamma, approx_reciprocal, hard_targets,
                       t_total, t_block, nt):
    t = pl.program_id(1)

    @pl.when(t == 0)
    def _():
        run_ref[...] = jnp.full(run_ref.shape, -jnp.inf, run_ref.dtype)

    def _update(valid_t):
        # Static sub-slice handles the ragged T tail without masks/pads.
        fw = fw_ref[:, 0:valid_t, :]                          # (Bb, valid_t, C)
        cur = jnp.max(fw, axis=1).astype(jnp.float32)         # (Bb, C)
        run_ref[...] = jnp.maximum(run_ref[...], cur)

    if t_total % t_block == 0:
        _update(t_block)
    else:
        @pl.when(t < nt - 1)
        def _():
            _update(t_block)

        @pl.when(t == nt - 1)
        def _():
            _update(t_total - (nt - 1) * t_block)

    @pl.when(t == nt - 1)
    def _():
        # Epilogue: both focal terms share the resident target tile.  Ragged B
        # rows produce garbage that is dropped by Pallas output clipping.
        kw = dict(alpha=alpha, gamma=gamma,
                  approx_reciprocal=approx_reciprocal, hard_targets=hard_targets)
        tt = tgt_ref[...].astype(jnp.float32)
        main_ref[...] = _focal_elem(logit_ref[...].astype(jnp.float32), tt, **kw)
        aux_ref[...] = _focal_elem(run_ref[...], tt, **kw)


def bce_focal_2way_loss(logit, framewise_logit, target, weights=(1.0, 1.0),
                        alpha=0.25, gamma=2.0, *, approx_reciprocal=True,
                        hard_targets=False, b_block=None, t_block=None):
    """Pallas equivalent of BCEFocal2WayLoss.forward.

    loss = w0 * focal(logit, tgt) + w1 * focal(max_T(framewise_logit), tgt)
    """
    B, T, C = framewise_logit.shape
    assert logit.shape == (B, C) and target.shape == (B, C)

    cap = _vmem_capacity_bytes()
    budget = _per_tile_budget_bytes(cap)
    c_pad = _round_up(C, LANES)
    fw_item = jnp.dtype(framewise_logit.dtype).itemsize

    # B tiling: the leading dim of the 3-D framewise block is unconstrained,
    # but the 2-D logit/target/output blocks need Bb % 8 == 0 (or Bb == B).
    # Bb == 8 by default -> >= 2 parallel B blocks whenever B > 8 (megacore).
    if B <= SUBLANES:
        bb = B
    else:
        bb = SUBLANES if b_block is None else max(
            SUBLANES, _round_down(int(b_block), SUBLANES))
        bb = min(bb, _round_up(B, SUBLANES))

    # T tiling (pipelined, "arbitrary" reduction axis): biggest block that
    # fits the per-tile VMEM budget, multiple of 8 unless it covers all of T.
    # TODO(synk): block over C as well if num_classes ever grows past a few k.
    if t_block is not None:
        tb = T if int(t_block) >= T else max(
            SUBLANES, _round_down(int(t_block), SUBLANES))
    else:
        per_t_bytes = max(bb * c_pad * fw_item, 1)
        tb = max(SUBLANES, _round_down(budget // per_t_bytes, SUBLANES))
        if tb >= T:
            tb = T
    nt = pl.cdiv(T, tb)
    nb_b = pl.cdiv(B, bb)

    fw_tile_bytes = bb * tb * c_pad * max(fw_item, 2)
    small_bytes = bb * c_pad * 4
    vmem_limit = int(min(max(3 * fw_tile_bytes + 10 * small_bytes + (8 << 20),
                             16 << 20),
                         cap - (8 << 20)))

    n = B * C
    cost = pl.CostEstimate(
        flops=int(B * T * C + 2 * 20 * n),
        transcendentals=int(2 * 3 * n),
        bytes_accessed=int(framewise_logit.size * fw_item
                           + n * (jnp.dtype(logit.dtype).itemsize
                                  + jnp.dtype(target.dtype).itemsize)
                           + 2 * n * 4))

    kernel = functools.partial(
        _fused_2way_kernel, alpha=alpha, gamma=gamma,
        approx_reciprocal=approx_reciprocal, hard_targets=hard_targets,
        t_total=T, t_block=tb, nt=nt)

    main_map, aux_map = pl.pallas_call(
        kernel,
        out_shape=(jax.ShapeDtypeStruct((B, C), jnp.float32),
                   jax.ShapeDtypeStruct((B, C), jnp.float32)),
        grid_spec=pltpu.PrefetchScalarGridSpec(
            num_scalar_prefetch=0,
            grid=(nb_b, nt),
            in_specs=[
                pl.BlockSpec((bb, tb, C), lambda b, t: (b, t, 0)),
                pl.BlockSpec((bb, C), lambda b, t: (b, 0)),
                pl.BlockSpec((bb, C), lambda b, t: (b, 0)),
            ],
            out_specs=[
                pl.BlockSpec((bb, C), lambda b, t: (b, 0)),
                pl.BlockSpec((bb, C), lambda b, t: (b, 0)),
            ],
            scratch_shapes=[pltpu.VMEM((bb, C), jnp.float32)],
        ),
        compiler_params=pltpu.CompilerParams(
            dimension_semantics=("parallel", "arbitrary"),
            vmem_limit_bytes=vmem_limit,
        ),
        cost_estimate=cost,
    )(framewise_logit, logit, target)

    # The (B, C) loss maps are T-times smaller than the streamed input, so the
    # final reduce + weighted combine is a trivial XLA epilogue.
    denom = jnp.float32(B * C)
    return (weights[0] * jnp.sum(main_map, dtype=jnp.float32)
            + weights[1] * jnp.sum(aux_map, dtype=jnp.float32)) / denom


# -------------------- standalone focal loss (BCEFocalLoss) -------------------

def _focal_rows_kernel(x_ref, t_ref, o_ref, *, alpha, gamma, approx_reciprocal,
                       hard_targets, rows_total, block_rows, slab_rows):
    x = x_ref[...].astype(jnp.float32)
    t = t_ref[...].astype(jnp.float32)
    loss = _focal_elem(x, t, alpha=alpha, gamma=gamma,
                       approx_reciprocal=approx_reciprocal,
                       hard_targets=hard_targets)
    if rows_total % block_rows != 0:
        # Ragged last row-block handled in-kernel (no jnp.pad of the inputs).
        row = (pl.program_id(0) * block_rows
               + jax.lax.broadcasted_iota(jnp.int32, loss.shape, 0))
        loss = jnp.where(row < rows_total, loss, 0.0)
    br, c = loss.shape
    if br == slab_rows:
        o_ref[...] = loss
    else:
        # (8, C) partial-sum slab: VPU adds only; the single cross-lane reduce
        # happens once, in the wrapper.
        o_ref[...] = loss.reshape(br // slab_rows, slab_rows, c).sum(axis=0)


def focal_loss_mean(preds, targets, *, alpha=0.25, gamma=2.0,
                    approx_reciprocal=True, hard_targets=False,
                    block_rows=None):
    """Mean focal BCE-with-logits over all elements (BCEFocalLoss.forward)."""
    assert preds.shape == targets.shape
    if preds.ndim == 1:
        preds, targets = preds[None, :], targets[None, :]
    elif preds.ndim > 2:
        preds = preds.reshape(-1, preds.shape[-1])
        targets = targets.reshape(-1, targets.shape[-1])
    R, C = preds.shape
    n = R * C

    cap = _vmem_capacity_bytes()
    budget = _per_tile_budget_bytes(cap)
    c_pad = _round_up(C, LANES)
    item = max(jnp.dtype(preds.dtype).itemsize, jnp.dtype(targets.dtype).itemsize)

    if R <= SUBLANES:
        rb, slab = R, R
    else:
        if block_rows is not None:
            rb = max(SUBLANES, _round_down(int(block_rows), SUBLANES))
        else:
            fit = max(SUBLANES, _round_down(budget // (c_pad * item), SUBLANES))
            # Guarantee >= 2 row blocks once the input is big enough (v7x).
            rb = min(fit, _round_up(pl.cdiv(R, 2), SUBLANES))
        rb = max(SUBLANES, min(rb, _round_up(R, SUBLANES)))
        slab = SUBLANES
    nb = pl.cdiv(R, rb)

    in_tile = rb * c_pad * (jnp.dtype(preds.dtype).itemsize
                            + jnp.dtype(targets.dtype).itemsize)
    vmem_limit = int(min(max(2 * in_tile + (16 << 20), 16 << 20),
                         cap - (8 << 20)))

    cost = pl.CostEstimate(
        flops=int(20 * n), transcendentals=int(3 * n),
        bytes_accessed=int(n * (jnp.dtype(preds.dtype).itemsize
                                + jnp.dtype(targets.dtype).itemsize)
                           + nb * slab * C * 4))

    kernel = functools.partial(
        _focal_rows_kernel, alpha=alpha, gamma=gamma,
        approx_reciprocal=approx_reciprocal, hard_targets=hard_targets,
        rows_total=R, block_rows=rb, slab_rows=slab)

    partials = pl.pallas_call(
        kernel,
        out_shape=jax.ShapeDtypeStruct((nb * slab, C), jnp.float32),
        grid_spec=pltpu.PrefetchScalarGridSpec(
            num_scalar_prefetch=0,
            grid=(nb,),
            in_specs=[pl.BlockSpec((rb, C), lambda i: (i, 0)),
                      pl.BlockSpec((rb, C), lambda i: (i, 0))],
            out_specs=pl.BlockSpec((slab, C), lambda i: (i, 0)),
        ),
        compiler_params=pltpu.CompilerParams(
            dimension_semantics=("parallel",),
            vmem_limit_bytes=vmem_limit,
        ),
        cost_estimate=cost,
    )(preds, targets)

    return jnp.sum(partials, dtype=jnp.float32) / jnp.float32(n)


# ---------------------------- pure-JAX reference -----------------------------

def _focal_reference(x, t, alpha=0.25, gamma=2.0):
    x = x.astype(jnp.float32)
    t = t.astype(jnp.float32)
    bce = jnp.maximum(x, 0.0) - x * t + jnp.log1p(jnp.exp(-jnp.abs(x)))
    p = jax.nn.sigmoid(x)
    loss = t * alpha * (1.0 - p) ** gamma * bce + (1.0 - t) * p ** gamma * bce
    return jnp.mean(loss)


def _reference_2way(logit, framewise, target, weights=(1.0, 1.0)):
    clip = jnp.max(framewise, axis=1)
    return (weights[0] * _focal_reference(logit, target)
            + weights[1] * _focal_reference(clip, target))


if __name__ == "__main__":
    key = jax.random.PRNGKey(0)
    keys = jax.random.split(key, 8)

    # Shapes consistent with the module: logit (B, C), framewise (B, T, C),
    # target (B, C).
    B, T, C = 2, 8, 4
    logit = jax.random.normal(keys[0], (B, C), dtype=jnp.float32) * 2.0
    framewise = jax.random.normal(keys[1], (B, T, C), dtype=jnp.float32) * 2.0
    target = jax.random.bernoulli(keys[2], p=0.3, shape=(B, C)).astype(jnp.float32)

    ref = jax.block_until_ready(_reference_2way(logit, framewise, target))

    # Default (approximate-reciprocal) path: sanity check.
    out = jax.block_until_ready(bce_focal_2way_loss(logit, framewise, target))
    assert jnp.allclose(out, ref, rtol=2e-2, atol=1e-4), (out, ref)

    # Exact-reciprocal path: tight check.
    out_exact = jax.block_until_ready(
        bce_focal_2way_loss(logit, framewise, target, approx_reciprocal=False))
    assert jnp.allclose(out_exact, ref, rtol=1e-5, atol=1e-6), (out_exact, ref)

    # Ragged B (10 % 8 != 0), ragged T tail (20 % 8 != 0), multi-block grid.
    B2, T2, C2 = 10, 20, 17
    logit2 = jax.random.normal(keys[3], (B2, C2), dtype=jnp.float32) * 2.0
    framewise2 = jax.random.normal(keys[4], (B2, T2, C2), dtype=jnp.float32) * 2.0
    target2 = jax.random.bernoulli(keys[5], p=0.3, shape=(B2, C2)).astype(jnp.float32)
    out2 = jax.block_until_ready(
        bce_focal_2way_loss(logit2, framewise2, target2,
                            t_block=8, approx_reciprocal=False))
    ref2 = jax.block_until_ready(_reference_2way(logit2, framewise2, target2))
    assert jnp.allclose(out2, ref2, rtol=1e-5, atol=1e-6), (out2, ref2)

    # Standalone focal kernel: ragged rows, multi-block parallel grid, no pads.
    x3 = jax.random.normal(keys[6], (37, 19), dtype=jnp.float32) * 2.0
    t3 = jax.random.bernoulli(keys[7], p=0.3, shape=(37, 19)).astype(jnp.float32)
    got = jax.block_until_ready(focal_loss_mean(x3, t3, approx_reciprocal=False))
    ref3 = jax.block_until_ready(_focal_reference(x3, t3))
    assert jnp.allclose(got, ref3, rtol=1e-5, atol=1e-6), (got, ref3)

    print("KERNEL_OK")
</pallas_src>

<mosaic_0001>
module attributes {stable_mosaic.version = 11 : i64} {
  func.func @_fused_2way_kernel(%arg0: i32, %arg1: i32, %arg2: memref<2x8x4xf32, #tpu.memory_space<vmem>>, %arg3: memref<2x4xf32, #tpu.memory_space<vmem>>, %arg4: memref<2x4xf32, #tpu.memory_space<vmem>>, %arg5: memref<2x4xf32, #tpu.memory_space<vmem>>, %arg6: memref<2x4xf32, #tpu.memory_space<vmem>>, %arg7: memref<2x4xf32, #tpu.memory_space<vmem>>) attributes {dimension_semantics = [#tpu.dimension_semantics<parallel>, #tpu.dimension_semantics<arbitrary>], iteration_bounds = array<i64: 1, 1>, scalar_prefetch = 0 : i64, scratch_operands = 1 : i64, tpu.core_type = #tpu.core_type<tc>, window_params = [{transform_indices = @transform_0, window_bounds = array<i64: 2, 8, 4>}, {transform_indices = @transform_1, window_bounds = array<i64: 2, 4>}, {transform_indices = @transform_2, window_bounds = array<i64: 2, 4>}, {transform_indices = @transform_3, window_bounds = array<i64: 2, 4>}, {transform_indices = @transform_4, window_bounds = array<i64: 2, 4>}]} {
    %c0_i32 = arith.constant 0 : i32
    %0 = arith.cmpi eq, %arg1, %c0_i32 : i32
    %1 = arith.extui %0 : i1 to i32
    %c0_i32_0 = arith.constant 0 : i32
    %2 = arith.cmpi ne, %1, %c0_i32_0 : i32
    scf.if %2 {
      %cst_9 = arith.constant 0xFF800000 : f32
      %11 = vector.broadcast %cst_9 : f32 to vector<2x4xf32>
      %c0_10 = arith.constant 0 : index
      %c0_11 = arith.constant 0 : index
      %12 = vector.load %arg7[%c0_10, %c0_11] : memref<2x4xf32, #tpu.memory_space<vmem>>, vector<2x4xf32>
      tpu.vector_store %arg7[%c0_10, %c0_11], %11 {strides = array<i32>} : memref<2x4xf32, #tpu.memory_space<vmem>>, vector<2x4xf32>,
    } else {
    }
    %c0 = arith.constant 0 : index
    %c0_1 = arith.constant 0 : index
    %c0_2 = arith.constant 0 : index
    %3 = vector.load %arg2[%c0, %c0_1, %c0_2] : memref<2x8x4xf32, #tpu.memory_space<vmem>>, vector<2x8x4xf32>
    %cst = arith.constant dense<0xFF800000> : vector<2x4xf32>
    %4 = vector.multi_reduction <maximumf>, %3, %cst [1] : vector<2x8x4xf32> to vector<2x4xf32>
    %c0_3 = arith.constant 0 : index
    %c0_4 = arith.constant 0 : index
    %5 = vector.load %arg7[%c0_3, %c0_4] : memref<2x4xf32, #tpu.memory_space<vmem>>, vector<2x4xf32>
    %6 = arith.maximumf %5, %4 : vector<2x4xf32>
    %c0_5 = arith.constant 0 : index
    %c0_6 = arith.constant 0 : index
    %7 = vector.load %arg7[%c0_5, %c0_6] : memref<2x4xf32, #tpu.memory_space<vmem>>, vector<2x4xf32>
    tpu.vector_store %arg7[%c0_5, %c0_6], %6 {strides = array<i32>} : memref<2x4xf32, #tpu.memory_space<vmem>>, vector<2x4xf32>,
    %c0_i32_7 = arith.constant 0 : i32
    %8 = arith.cmpi eq, %arg1, %c0_i32_7 : i32
    %9 = arith.extui %8 : i1 to i32
    %c0_i32_8 = arith.constant 0 : i32
    %10 = arith.cmpi ne, %9, %c0_i32_8 : i32
    scf.if %10 {
      %c0_9 = arith.constant 0 : index
      %c0_10 = arith.constant 0 : index
      %11 = vector.load %arg4[%c0_9, %c0_10] : memref<2x4xf32, #tpu.memory_space<vmem>>, vector<2x4xf32>
      %c0_11 = arith.constant 0 : index
      %c0_12 = arith.constant 0 : index
      %12 = vector.load %arg3[%c0_11, %c0_12] : memref<2x4xf32, #tpu.memory_space<vmem>>, vector<2x4xf32>
      %13 = math.absf %12 : vector<2x4xf32>
      %cst_13 = arith.constant 0.000000e+00 : f32
      %14 = vector.broadcast %cst_13 : f32 to vector<2x4xf32>
      %15 = arith.subf %14, %13 : vector<2x4xf32>
      %16 = math.exp %15 : vector<2x4xf32>
      %cst_14 = arith.constant 0.000000e+00 : f32
      %17 = vector.broadcast %cst_14 : f32 to vector<2x4xf32>
      %18 = arith.maximumf %12, %17 : vector<2x4xf32>
      %19 = arith.mulf %12, %11 : vector<2x4xf32>
      %20 = arith.subf %18, %19 : vector<2x4xf32>
      %21 = math.log1p %16 : vector<2x4xf32>
      %22 = arith.addf %20, %21 : vector<2x4xf32>
      %cst_15 = arith.constant 1.000000e+00 : f32
      %23 = vector.broadcast %cst_15 : f32 to vector<2x4xf32>
      %24 = arith.addf %23, %16 : vector<2x4xf32>
      %25 = tpu.reciprocal %24 {approx = true} : vector<2x4xf32> -> vector<2x4xf32>
      %cst_16 = arith.constant 0.000000e+00 : f32
      %26 = vector.broadcast %cst_16 : f32 to vector<2x4xf32>
      %27 = arith.cmpf oge, %12, %26 : vector<2x4xf32>
      %cst_17 = arith.constant 1.000000e+00 : f32
      %28 = vector.broadcast %cst_17 : f32 to vector<2x4xf32>
      %29 = arith.subf %28, %25 : vector<2x4xf32>
      %30 = arith.select %27, %25, %29 : vector<2x4xi1>, vector<2x4xf32>
      %cst_18 = arith.constant 1.000000e+00 : f32
      %31 = vector.broadcast %cst_18 : f32 to vector<2x4xf32>
      %32 = arith.subf %31, %30 : vector<2x4xf32>
      %cst_19 = arith.constant 1.000000e+00 : f32
      %33 = vector.broadcast %cst_19 : f32 to vector<2x4xf32>
      %34 = arith.subf %33, %30 : vector<2x4xf32>
      %35 = arith.mulf %32, %34 : vector<2x4xf32>
      %36 = arith.mulf %30, %30 : vector<2x4xf32>
      %cst_20 = arith.constant 2.500000e-01 : f32
      %37 = vector.broadcast %cst_20 : f32 to vector<2x4xf32>
      %38 = arith.mulf %37, %11 : vector<2x4xf32>
      %39 = arith.mulf %38, %35 : vector<2x4xf32>
      %cst_21 = arith.constant 1.000000e+00 : f32
      %40 = vector.broadcast %cst_21 : f32 to vector<2x4xf32>
      %41 = arith.subf %40, %11 : vector<2x4xf32>
      %42 = arith.mulf %41, %36 : vector<2x4xf32>
      %43 = arith.addf %39, %42 : vector<2x4xf32>
      %44 = arith.mulf %22, %43 : vector<2x4xf32>
      %c0_22 = arith.constant 0 : index
      %c0_23 = arith.constant 0 : index
      %45 = vector.load %arg5[%c0_22, %c0_23] : memref<2x4xf32, #tpu.memory_space<vmem>>, vector<2x4xf32>
      tpu.vector_store %arg5[%c0_22, %c0_23], %44 {strides = array<i32>} : memref<2x4xf32, #tpu.memory_space<vmem>>, vector<2x4xf32>,
      %c0_24 = arith.constant 0 : index
      %c0_25 = arith.constant 0 : index
      %46 = vector.load %arg7[%c0_24, %c0_25] : memref<2x4xf32, #tpu.memory_space<vmem>>, vector<2x4xf32>
      %47 = math.absf %46 : vector<2x4xf32>
      %cst_26 = arith.constant 0.000000e+00 : f32
      %48 = vector.broadcast %cst_26 : f32 to vector<2x4xf32>
      %49 = arith.subf %48, %47 : vector<2x4xf32>
      %50 = math.exp %49 : vector<2x4xf32>
      %cst_27 = arith.constant 0.000000e+00 : f32
      %51 = vector.broadcast %cst_27 : f32 to vector<2x4xf32>
      %52 = arith.maximumf %46, %51 : vector<2x4xf32>
      %53 = arith.mulf %46, %11 : vector<2x4xf32>
      %54 = arith.subf %52, %53 : vector<2x4xf32>
      %55 = math.log1p %50 : vector<2x4xf32>
      %56 = arith.addf %54, %55 : vector<2x4xf32>
      %cst_28 = arith.constant 1.000000e+00 : f32
      %57 = vector.broadcast %cst_28 : f32 to vector<2x4xf32>
      %58 = arith.addf %57, %50 : vector<2x4xf32>
      %59 = tpu.reciprocal %58 {approx = true} : vector<2x4xf32> -> vector<2x4xf32>
      %cst_29 = arith.constant 0.000000e+00 : f32
      %60 = vector.broadcast %cst_29 : f32 to vector<2x4xf32>
      %61 = arith.cmpf oge, %46, %60 : vector<2x4xf32>
      %cst_30 = arith.constant 1.000000e+00 : f32
      %62 = vector.broadcast %cst_30 : f32 to vector<2x4xf32>
      %63 = arith.subf %62, %59 : vector<2x4xf32>
      %64 = arith.select %61, %59, %63 : vector<2x4xi1>, vector<2x4xf32>
      %cst_31 = arith.constant 1.000000e+00 : f32
      %65 = vector.broadcast %cst_31 : f32 to vector<2x4xf32>
      %66 = arith.subf %65, %64 : vector<2x4xf32>
      %cst_32 = arith.constant 1.000000e+00 : f32
      %67 = vector.broadcast %cst_32 : f32 to vector<2x4xf32>
      %68 = arith.subf %67, %64 : vector<2x4xf32>
      %69 = arith.mulf %66, %68 : vector<2x4xf32>
      %70 = arith.mulf %64, %64 : vector<2x4xf32>
      %cst_33 = arith.constant 2.500000e-01 : f32
      %71 = vector.broadcast %cst_33 : f32 to vector<2x4xf32>
      %72 = arith.mulf %71, %11 : vector<2x4xf32>
      %73 = arith.mulf %72, %69 : vector<2x4xf32>
      %cst_34 = arith.constant 1.000000e+00 : f32
      %74 = vector.broadcast %cst_34 : f32 to vector<2x4xf32>
      %75 = arith.subf %74, %11 : vector<2x4xf32>
      %76 = arith.mulf %75, %70 : vector<2x4xf32>
      %77 = arith.addf %73, %76 : vector<2x4xf32>
      %78 = arith.mulf %56, %77 : vector<2x4xf32>
      %c0_35 = arith.constant 0 : index
      %c0_36 = arith.constant 0 : index
      %79 = vector.load %arg6[%c0_35, %c0_36] : memref<2x4xf32, #tpu.memory_space<vmem>>, vector<2x4xf32>
      tpu.vector_store %arg6[%c0_35, %c0_36], %78 {strides = array<i32>} : memref<2x4xf32, #tpu.memory_space<vmem>>, vector<2x4xf32>,
    } else {
    }
    return
  }
  func.func @transform_0(%arg0: i32, %arg1: i32) -> (i32, i32, i32) {
    %c0_i32 = arith.constant 0 : i32
    %c0_i32_0 = arith.constant 0 : i32
    return %arg0, %arg1, %c0_i32 : i32, i32, i32
  }
  func.func @transform_1(%arg0: i32, %arg1: i32) -> (i32, i32) {
    %c0_i32 = arith.constant 0 : i32
    %c0_i32_0 = arith.constant 0 : i32
    return %arg0, %c0_i32 : i32, i32
  }
  func.func @transform_2(%arg0: i32, %arg1: i32) -> (i32, i32) {
    %c0_i32 = arith.constant 0 : i32
    %c0_i32_0 = arith.constant 0 : i32
    return %arg0, %c0_i32 : i32, i32
  }
  func.func @transform_3(%arg0: i32, %arg1: i32) -> (i32, i32) {
    %c0_i32 = arith.constant 0 : i32
    %c0_i32_0 = arith.constant 0 : i32
    return %arg0, %c0_i32 : i32, i32
  }
  func.func @transform_4(%arg0: i32, %arg1: i32) -> (i32, i32) {
    %c0_i32 = arith.constant 0 : i32
    %c0_i32_0 = arith.constant 0 : i32
    return %arg0, %c0_i32 : i32, i32
  }
}

</mosaic_0001>

<bundles_post_ra>
// kernel: tpu_custom_call.1
= control target key start
LH: loop header
LB: loop body
LE: loop exit
PB: predicated region body
PF: predicated region fallthrough
CT: control target
= control target key end

     0   :  { %10 = vsyncpa [#allocation4], 0  ;;  %vm22_vm0 = vcmask 25600   ;;  %vm26_vm1 = vcmask 31744   ;;  %v205_v2 = vmov -inf   ;;  %s261_s0 = inlined_call_operand.vmem [shape: f32[2,8,4], index: 0, kind: input, shape index: {}]   ;;  %s262_s1 = inlined_call_operand.vmem [shape: f32[2,4], index: 1, kind: input, shape index: {}]   ;;  %s263_s2 = inlined_call_operand.vmem [shape: f32[2,4], index: 2, kind: input, shape index: {}]   ;;  %s264_s3 = inlined_call_operand.hbm [shape: f32[2,4], index: 3, kind: output, shape index: {0}]   ;;  %s265_s4 = inlined_call_operand.hbm [shape: f32[2,4], index: 4, kind: output, shape index: {1}]  }
   0x1   :  { %v24_v0 = vld [vmem:[%s261_s0] sm:$0xff]  ;;  %v25_v1 = vld [vmem:[%s261_s0 + $0x8] sm:$0xff]  ;;  %23 = vst.msk [vmem:[#allocation2] sm:$0x3] %vm22_vm0, %v205_v2 }
   0x2   :  { %v27_v3 = vsel %vm26_vm1, %v24_v0, -inf  ;;  %v34_v4 = vsel %vm26_vm1, %v25_v1, -inf  ;;  %v54_v5 = vld [vmem:[%s262_s1] sm:$0x3] }
   0x3   :  { %v28_v6 = vrot.slane %v27_v3, 4  ;;  %v35_v7 = vrot.slane %v34_v4, 4  ;;  %v55_v8 = vand.u32 2147483647, %v54_v5 }
   0x4   :  { %11 = vsyncpa [#allocation6], 0  ;;  %vm44_vm2 = vcmask 1041409   ;;  %v53_v34 = vld [vmem:[%s263_s2] sm:$0x3]  ;;  %v59_v36 = vmax.f32 %v54_v5, 0.0 }
   0x5   :  { %v29_v9 = vmax.f32 %v27_v3, %v28_v6  ;;  %v36_v10 = vmax.f32 %v34_v4, %v35_v7  ;;  %v56_v11 = vsub.f32 0.0, %v55_v8  ;;  %v60_v37 = vmul.f32 %v54_v5, %v53_v34  ;;  %s206_s2 = smov [#allocation3]  }
   0x6   :  { %vm74_vm3 = vcmp.ge.f32.partialorder %v54_v5, 0.0  ;;  %v80_v42 = vmul.f32 0.25, %v53_v34  ;;  %v82_v46 = vsub.f32 1.0, %v53_v34  ;;  %s124_s21 = sshll.u32 %s206_s2, 4  ;;  %s125_s21 = int_to_ptr.vmem [resolvable:$true] %s124_s21 }
   0x7   :  { %v30_v12 = vrot.slane %v29_v9, 2  ;;  %v37_v13 = vrot.slane %v36_v10, 2  ;;  %v57_v14 = vmul.f32 1.442695, %v56_v11  ;;  %v61_v43 = vsub.f32 %v59_v36, %v60_v37  ;;  %s161_s22 = scalar_lea.vmem %s125_s21, 32  ;;  %p166_p1 = scmp.lt.s32.totalorder %s125_s21, %s125_s21 }
   0x8   :  { %v41_v21 = vld [vmem:[#allocation2] sm:$0x3]  ;;  %p162_p0 = scmp.ne.s32.totalorder %s125_s21, %s161_s22  ;;  %p167_p2 = scmp.lt.s32.totalorder %s161_s22, %s161_s22 }
   0x9   :  { %v31_v15 = vmax.f32 %v29_v9, %v30_v12  ;;  %v38_v16 = vmax.f32 %v36_v10, %v37_v13  ;;  %149 = vpow2.f32 %v57_v14 }
   0xa   :  { %p168_p3 = por %p167_p2, %p166_p1 }
   0xb   :  { %v32_v17 = vrot.slane %v31_v15, 1  ;;  %v39_v18 = vrot.slane %v38_v16, 1 }
   0xc   :  { %p169_p4 = pnand %p168_p3, %p162_p0 }
   0xd   :  { %v33_v19 = vmax.f32 %v31_v15, %v32_v17  ;;  %v40_v20 = vmax.f32 %v38_v16, %v39_v18 }
   0xf   :  { %v45_v22 = vsel %vm44_vm2, %v40_v20, %v33_v19 }
  0x10   :  { %v47_v23 = vmax.f32 %v41_v21, %v45_v22 }
  0x12   :  { %49 = vst.msk [vmem:[#allocation2] sm:$0x3] %vm22_vm0, %v47_v23 }
  0x16   :  { %v150_v24 = vpop.eup %149 }
  0x17   :  { %v62_v25 = vadd.f32 1.0, %v150_v24  ;;  %v65_v30 = vmul.f32 -0.5, %v150_v24  ;;  %v68_v32 = vand.u32 2147483647, %v150_v24 }
  0x19   :  { %151 = vlog2.f32 %v62_v25  ;;  %v244_v26 = vld [vmem:[#allocation2] sm:$0x3]  ;;  %v66_v31 = vadd.f32 1.0, %v65_v30  ;;  %vm69_vm4 = vcmp.lt.f32.partialorder %v68_v32, 0.0004427343 }
  0x1a   :  { %153 = vrcp.f32 %v62_v25  ;;  %v88_v27 = vand.u32 2147483647, %v244_v26 }
  0x1b   :  { %v67_v39 = vmul.f32 %v150_v24, %v66_v31 }
  0x1c   :  { %v89_v28 = vsub.f32 0.0, %v88_v27 }
  0x1e   :  { %v90_v29 = vmul.f32 1.442695, %v89_v28 }
  0x20   :  { %155 = vpow2.f32 %v90_v29 }
  0x26   :  { %v152_v33 = vpop.eup %151 }
  0x27   :  { %v154_v35 = vpop.eup %153  ;;  %v64_v38 = vmul.f32 0.6931472, %v152_v33 }
  0x28   :  { %v75_v40 = vsub.f32 1.0, %v154_v35 }
  0x29   :  { %v70_v47 = vsel %vm69_vm4, %v67_v39, %v64_v38 }
  0x2a   :  { %v76_v41 = vsel %vm74_vm3, %v154_v35, %v75_v40  ;;  %v71_v52 = vadd.f32 %v70_v47, %v61_v43 }
  0x2b   :  { %v77_v44 = vsub.f32 1.0, %v76_v41  ;;  %v79_v45 = vmul.f32 %v76_v41, %v76_v41 }
  0x2d   :  { %v156_v48 = vpop.eup %155  ;;  %v78_v49 = vmul.f32 %v77_v44, %v77_v44  ;;  %v83_v50 = vmul.f32 %v82_v46, %v79_v45 }
  0x2e   :  { %v95_v51 = vadd.f32 1.0, %v156_v48 }
  0x2f   :  { %v81_v53 = vmul.f32 %v80_v42, %v78_v49 }
  0x30   :  { %157 = vlog2.f32 %v95_v51 }
  0x31   :  { %v84_v54 = vadd.f32 %v83_v50, %v81_v53  ;;  %159 = vrcp.f32 %v95_v51 }
  0x33   :  { %v85_v55 = vmul.f32 %v84_v54, %v71_v52 }
  0x35   :  { %86 = vst.msk [vmem:[#allocation3] sm:$0x3] %vm22_vm0, %v85_v55 }
  0x36   :  { %172 = shalt.err (!%p169_p4)
}
  0x37   :  { %127 = dma.vmem_to_hbm [thread:$0]  %s125_s21, 32, %s264_s3, [#allocation4]   ;;  %v98_v56 = vmul.f32 -0.5, %v156_v48  ;;  %v101_v61 = vand.u32 2147483647, %v156_v48  ;;  %vm107_vm5 = vcmp.ge.f32.partialorder %v244_v26, 0.0  ;;  %v93_v1 = vmul.f32 %v244_v26, %v53_v34 }
  0x38   :  { %v92_v0 = vmax.f32 %v244_v26, 0.0  ;;  %s207_s3 = smov [#allocation5]  }
  0x39   :  { %v99_v59 = vadd.f32 1.0, %v98_v56  ;;  %vm102_vm6 = vcmp.lt.f32.partialorder %v101_v61, 0.0004427343  ;;  %s134_s25 = sshll.u32 %s207_s3, 4  ;;  %s135_s25 = int_to_ptr.vmem [resolvable:$true] %s134_s25 }
  0x3a   :  { %v94_v7 = vsub.f32 %v92_v0, %v93_v1  ;;  %s181_s26 = scalar_lea.vmem %s135_s25, 32  ;;  %p186_p6 = scmp.lt.s32.totalorder %s135_s25, %s135_s25 }
  0x3b   :  { %v100_v4 = vmul.f32 %v156_v48, %v99_v59  ;;  %p182_p5 = scmp.ne.s32.totalorder %s135_s25, %s181_s26  ;;  %p187_p7 = scmp.lt.s32.totalorder %s181_s26, %s181_s26 }
  0x3d   :  { %v158_v57 = vpop.eup %157  ;;  %p188_p8 = por %p187_p7, %p186_p6 }
  0x3e   :  { %v160_v58 = vpop.eup %159  ;;  %v97_v62 = vmul.f32 0.6931472, %v158_v57 }
  0x3f   :  { %v108_v60 = vsub.f32 1.0, %v160_v58  ;;  %p189_p9 = pnand %p188_p8, %p182_p5 }
  0x40   :  { %v103_v6 = vsel %vm102_vm6, %v100_v4, %v97_v62 }
  0x41   :  { %v109_v63 = vsel %vm107_vm5, %v160_v58, %v108_v60  ;;  %v104_v10 = vadd.f32 %v103_v6, %v94_v7 }
  0x42   :  { %v110_v2 = vsub.f32 1.0, %v109_v63  ;;  %v112_v3 = vmul.f32 %v109_v63, %v109_v63 }
  0x44   :  { %v111_v5 = vmul.f32 %v110_v2, %v110_v2  ;;  %v114_v9 = vmul.f32 %v112_v3, %v82_v46 }
  0x46   :  { %v113_v8 = vmul.f32 %v111_v5, %v80_v42 }
  0x48   :  { %v115_v11 = vadd.f32 %v114_v9, %v113_v8 }
  0x4a   :  { %v116_v12 = vmul.f32 %v115_v11, %v104_v10 }
  0x4c   :  { %117 = vst.msk [vmem:[#allocation5] sm:$0x3] %vm22_vm0, %v116_v12 }
  0x4d   :  { %192 = shalt.err (!%p189_p9)
}
  0x4e   :  { %137 = dma.vmem_to_hbm [thread:$0]  %s135_s25, 32, %s265_s4, [#allocation6]  }
  0x4f   :  { %201 = dma.done.wait [#allocation4], 32  }
  0x50   :  { %202 = vsyncadd [#allocation4], 4294967264 }
  0x51   :  { %203 = dma.done.wait [#allocation6], 32  }
  0x52   :  { %204 = vsyncadd [#allocation6], 4294967264 }
  0x53   :  { %144 = vsyncpa [#allocation4], 1 }
  0x54   :  { %145 = vsyncpa [#allocation6], 1 }

</bundles_post_ra>
